<compile_context>
chip_gen: v6e
topology: v6e:2x2x1
jax: 0.10.0
libtpu: 0.0.40
codegen_flags: <defaults>
</compile_context>

<pallas_src>
import functools
import math

import jax
import jax.numpy as jnp
from jax.experimental import pallas as pl
from jax.experimental.pallas import tpu as pltpu


def _pe_add_kernel(x_ref, t_ref, w1_ref, b1_ref, w2_ref, b2_ref, o_ref, *, f, H):
    """One row tile: o = x + (tanh(t*w1 + b1) @ W2^T + b2), with f rows folded per lane-row."""
    t = t_ref[...]                       # (R, f) f32
    w2_full = w2_ref[...]                # (f*H, f*D) block-diagonal (f==1 -> plain W2^T)
    acc = None
    for j in range(f):                   # f is a small static Python int
        # First Linear (in_features=1): degenerate K=1 -> pure VPU broadcast, no MXU.
        h = jnp.tanh(t[:, j:j + 1] * w1_ref[...] + b1_ref[...])          # (R, H) f32
        # Second Linear: rows [j*H:(j+1)*H] of the block-diagonal weight place the
        # result into lane block j of the folded (lane-dense) output.
        p = jnp.dot(h, w2_full[j * H:(j + 1) * H, :],
                    preferred_element_type=jnp.float32)                  # (R, f*D) f32
        acc = p if acc is None else acc + p
    emb = acc + b2_ref[...]                                               # (R, f*D) f32
    o_ref[...] = x_ref[...] + emb.astype(o_ref.dtype)


def _round_up(x, m):
    return (x + m - 1) // m * m


def _choose_tile_rows(n_rows, bytes_per_row):
    """Largest row tile fitting a VMEM budget safe on v5e/v6e/v7x; multiple of 8."""
    budget = 32 * 1024 * 1024                     # for double-buffered x-in + out tiles
    r = max(8, budget // max(4 * bytes_per_row, 1))
    r = min(r, 2048)
    if n_rows < 8:
        return n_rows                             # single block == full array dim
    r = min(r, n_rows)
    r = max(8, (r // 8) * 8)
    # Keep at least 2 grid steps when there is enough work (2 TensorCores on v7x).
    if n_rows >= 16 and pl.cdiv(n_rows, r) < 2:
        r = max(8, _round_up(pl.cdiv(n_rows, 2), 8))
    return r


def learned_positional_encoding(x, times, params, *, donate_x=False):
    """x: (B, S, D); times: (B, S). Returns x + pe(times), dtype = x.dtype."""
    w1, b1, w2, b2 = params["w1"], params["b1"], params["w2"], params["b2"]
    B, S, D = x.shape
    H = w1.shape[0]
    N = B * S

    # Lane-density fold: pack f consecutive rows into the 128-wide lane axis when possible.
    if D < 128 and 128 % D == 0 and N % (128 // D) == 0:
        f = 128 // D
    else:
        f = 1
    W = f * D                                    # folded row width (lane axis)
    n_rows = N // f

    x2 = x.reshape(n_rows, W)                    # native dtype: no wrapper upcast pass
    t2 = times.reshape(n_rows, f).astype(jnp.float32)

    # Tiny-weight glue (not the hot path).
    w1_r = w1.reshape(1, H).astype(jnp.float32)                       # (1, H)
    b1_r = b1.reshape(1, H).astype(jnp.float32)                       # (1, H)
    w2_big = jnp.kron(jnp.eye(f, dtype=jnp.float32),
                      w2.T.astype(jnp.float32))                       # (f*H, f*D)
    b2_r = jnp.tile(b2.astype(jnp.float32), f).reshape(1, W)          # (1, f*D)

    itemsize = jnp.dtype(x.dtype).itemsize
    tile_rows = _choose_tile_rows(n_rows, W * itemsize)
    grid = (pl.cdiv(n_rows, tile_rows),)

    # Explicit scoped-VMEM budget: double-buffered x/out + t tiles + weights + headroom,
    # capped well under v7x's 64 MiB physical VMEM.
    est = (4 * tile_rows * W * itemsize            # x in + out, 2 buffers each
           + 4 * tile_rows * f * 4                 # times tile
           + 2 * 4 * (w2_big.size + b2_r.size + w1_r.size + b1_r.size))
    vmem_limit = int(min(56 * 1024 * 1024, max(est + 4 * 1024 * 1024, 16 * 1024 * 1024)))

    kernel = functools.partial(_pe_add_kernel, f=f, H=H)

    out = pl.pallas_call(
        kernel,
        out_shape=jax.ShapeDtypeStruct((n_rows, W), x.dtype),
        grid_spec=pltpu.PrefetchScalarGridSpec(
            num_scalar_prefetch=0,
            grid=grid,
            in_specs=[
                pl.BlockSpec((tile_rows, W), lambda i: (i, 0)),       # x rows (lane-dense)
                pl.BlockSpec((tile_rows, f), lambda i: (i, 0)),       # times rows
                pl.BlockSpec((1, H), lambda i: (0, 0)),               # w1
                pl.BlockSpec((1, H), lambda i: (0, 0)),               # b1
                pl.BlockSpec((f * H, W), lambda i: (0, 0)),           # block-diag W2^T
                pl.BlockSpec((1, W), lambda i: (0, 0)),               # b2 (tiled)
            ],
            out_specs=pl.BlockSpec((tile_rows, W), lambda i: (i, 0)),
        ),
        compiler_params=pltpu.CompilerParams(
            dimension_semantics=("parallel",),
            vmem_limit_bytes=vmem_limit,
        ),
        input_output_aliases=({0: 0} if donate_x else {}),
    )(x2, t2, w1_r, b1_r, w2_big, b2_r)

    return out.reshape(B, S, D)


def init_params(key, d_model):
    """Deterministic init matching the PyTorch module's parameter shapes."""
    H = int(math.sqrt(d_model))
    k1, k2, k3, k4 = jax.random.split(key, 4)
    lim1 = 1.0
    w1 = jax.random.uniform(k1, (H, 1), jnp.float32, -lim1, lim1)      # Linear(1, H)
    b1 = jax.random.uniform(k2, (H,), jnp.float32, -lim1, lim1)
    lim2 = 1.0 / math.sqrt(H)
    w2 = jax.random.uniform(k3, (d_model, H), jnp.float32, -lim2, lim2)  # Linear(H, D)
    b2 = jax.random.uniform(k4, (d_model,), jnp.float32, -lim2, lim2)
    return {"w1": w1, "b1": b1, "w2": w2, "b2": b2}


def reference(x, times, params):
    """Pure-JAX reference of the PyTorch forward (highest precision matmuls)."""
    hp = jax.lax.Precision.HIGHEST
    t = times[..., None].astype(jnp.float32)                                     # (B,S,1)
    h = jnp.tanh(jnp.einsum("...i,hi->...h", t, params["w1"], precision=hp)
                 + params["b1"])                                                 # (B,S,H)
    emb = jnp.einsum("...h,dh->...d", h, params["w2"], precision=hp) + params["b2"]
    return x + emb


if __name__ == "__main__":
    key = jax.random.PRNGKey(0)
    d_model = 64          # H = int(sqrt(64)) = 8 ; D=64 < 128 -> fold f=2 rows per lane-row
    B, S = 2, 8

    kp, kx, kt = jax.random.split(key, 3)
    params = init_params(kp, d_model)
    x = jax.random.normal(kx, (B, S, d_model), jnp.float32)
    times = jax.random.uniform(kt, (B, S), jnp.float32, 0.0, 10.0)

    out = learned_positional_encoding(x, times, params)
    out = jax.block_until_ready(out)

    ref = reference(x, times, params)
    assert out.shape == (B, S, d_model)
    assert out.dtype == x.dtype
    assert jnp.allclose(out, ref, atol=1e-5, rtol=1e-5), "mismatch vs reference"
    print("KERNEL_OK")
</pallas_src>

<mosaic_0001>
module attributes {stable_mosaic.version = 11 : i64} {
  func.func @_pe_add_kernel(%arg0: i32, %arg1: memref<8x128xf32, #tpu.memory_space<vmem>>, %arg2: memref<8x2xf32, #tpu.memory_space<vmem>>, %arg3: memref<1x8xf32, #tpu.memory_space<vmem>>, %arg4: memref<1x8xf32, #tpu.memory_space<vmem>>, %arg5: memref<16x128xf32, #tpu.memory_space<vmem>>, %arg6: memref<1x128xf32, #tpu.memory_space<vmem>>, %arg7: memref<8x128xf32, #tpu.memory_space<vmem>>) attributes {dimension_semantics = [#tpu.dimension_semantics<parallel>], iteration_bounds = array<i64: 1>, scalar_prefetch = 0 : i64, scratch_operands = 0 : i64, tpu.core_type = #tpu.core_type<tc>, window_params = [{transform_indices = @transform_0, window_bounds = array<i64: 8, 128>}, {transform_indices = @transform_1, window_bounds = array<i64: 8, 2>}, {pipeline_mode = #tpu.pipeline_mode<synchronous>, transform_indices = @transform_2, window_bounds = array<i64: 1, 8>}, {pipeline_mode = #tpu.pipeline_mode<synchronous>, transform_indices = @transform_3, window_bounds = array<i64: 1, 8>}, {pipeline_mode = #tpu.pipeline_mode<synchronous>, transform_indices = @transform_4, window_bounds = array<i64: 16, 128>}, {pipeline_mode = #tpu.pipeline_mode<synchronous>, transform_indices = @transform_5, window_bounds = array<i64: 1, 128>}, {transform_indices = @transform_6, window_bounds = array<i64: 8, 128>}]} {
    %c0 = arith.constant 0 : index
    %c0_0 = arith.constant 0 : index
    %0 = vector.load %arg2[%c0, %c0_0] : memref<8x2xf32, #tpu.memory_space<vmem>>, vector<8x2xf32>
    %c0_1 = arith.constant 0 : index
    %c0_2 = arith.constant 0 : index
    %1 = vector.load %arg5[%c0_1, %c0_2] : memref<16x128xf32, #tpu.memory_space<vmem>>, vector<16x128xf32>
    %2 = vector.extract_strided_slice %0 {offsets = [0, 0], sizes = [8, 1], strides = [1, 1]} : vector<8x2xf32> to vector<8x1xf32>
    %c0_3 = arith.constant 0 : index
    %c0_4 = arith.constant 0 : index
    %3 = vector.load %arg3[%c0_3, %c0_4] : memref<1x8xf32, #tpu.memory_space<vmem>>, vector<1x8xf32>
    %4 = vector.broadcast %2 : vector<8x1xf32> to vector<8x8xf32>
    %5 = vector.broadcast %3 : vector<1x8xf32> to vector<8x8xf32>
    %6 = arith.mulf %4, %5 : vector<8x8xf32>
    %c0_5 = arith.constant 0 : index
    %c0_6 = arith.constant 0 : index
    %7 = vector.load %arg4[%c0_5, %c0_6] : memref<1x8xf32, #tpu.memory_space<vmem>>, vector<1x8xf32>
    %8 = vector.broadcast %7 : vector<1x8xf32> to vector<8x8xf32>
    %9 = arith.addf %6, %8 : vector<8x8xf32>
    %10 = math.tanh %9 : vector<8x8xf32>
    %11 = vector.extract_strided_slice %1 {offsets = [0, 0], sizes = [8, 128], strides = [1, 1]} : vector<16x128xf32> to vector<8x128xf32>
    %cst = arith.constant dense<0.000000e+00> : vector<8x128xf32>
    %12 = tpu.matmul %10, %11, %cst {dimension_numbers = #tpu.dot_dimension_numbers<[1], [0], [0], [1], [0, 0, 1, 1], [], []>} : vector<8x8xf32>, vector<8x128xf32>, vector<8x128xf32> -> vector<8x128xf32>
    %13 = vector.extract_strided_slice %0 {offsets = [0, 1], sizes = [8, 1], strides = [1, 1]} : vector<8x2xf32> to vector<8x1xf32>
    %c0_7 = arith.constant 0 : index
    %c0_8 = arith.constant 0 : index
    %14 = vector.load %arg3[%c0_7, %c0_8] : memref<1x8xf32, #tpu.memory_space<vmem>>, vector<1x8xf32>
    %15 = vector.broadcast %13 : vector<8x1xf32> to vector<8x8xf32>
    %16 = vector.broadcast %14 : vector<1x8xf32> to vector<8x8xf32>
    %17 = arith.mulf %15, %16 : vector<8x8xf32>
    %c0_9 = arith.constant 0 : index
    %c0_10 = arith.constant 0 : index
    %18 = vector.load %arg4[%c0_9, %c0_10] : memref<1x8xf32, #tpu.memory_space<vmem>>, vector<1x8xf32>
    %19 = vector.broadcast %18 : vector<1x8xf32> to vector<8x8xf32>
    %20 = arith.addf %17, %19 : vector<8x8xf32>
    %21 = math.tanh %20 : vector<8x8xf32>
    %22 = vector.extract_strided_slice %1 {offsets = [8, 0], sizes = [8, 128], strides = [1, 1]} : vector<16x128xf32> to vector<8x128xf32>
    %cst_11 = arith.constant dense<0.000000e+00> : vector<8x128xf32>
    %23 = tpu.matmul %21, %22, %cst_11 {dimension_numbers = #tpu.dot_dimension_numbers<[1], [0], [0], [1], [0, 0, 1, 1], [], []>} : vector<8x8xf32>, vector<8x128xf32>, vector<8x128xf32> -> vector<8x128xf32>
    %24 = arith.addf %12, %23 : vector<8x128xf32>
    %c0_12 = arith.constant 0 : index
    %c0_13 = arith.constant 0 : index
    %25 = vector.load %arg6[%c0_12, %c0_13] : memref<1x128xf32, #tpu.memory_space<vmem>>, vector<1x128xf32>
    %26 = vector.broadcast %25 : vector<1x128xf32> to vector<8x128xf32>
    %27 = arith.addf %24, %26 : vector<8x128xf32>
    %c0_14 = arith.constant 0 : index
    %c0_15 = arith.constant 0 : index
    %28 = vector.load %arg1[%c0_14, %c0_15] : memref<8x128xf32, #tpu.memory_space<vmem>>, vector<8x128xf32>
    %29 = arith.addf %28, %27 : vector<8x128xf32>
    %c0_16 = arith.constant 0 : index
    %c0_17 = arith.constant 0 : index
    %30 = vector.load %arg7[%c0_16, %c0_17] : memref<8x128xf32, #tpu.memory_space<vmem>>, vector<8x128xf32>
    tpu.vector_store %arg7[%c0_16, %c0_17], %29 {strides = array<i32>} : memref<8x128xf32, #tpu.memory_space<vmem>>, vector<8x128xf32>,
    return
  }
  func.func @transform_0(%arg0: i32) -> (i32, i32) {
    %c0_i32 = arith.constant 0 : i32
    %c0_i32_0 = arith.constant 0 : i32
    return %arg0, %c0_i32 : i32, i32
  }
  func.func @transform_1(%arg0: i32) -> (i32, i32) {
    %c0_i32 = arith.constant 0 : i32
    %c0_i32_0 = arith.constant 0 : i32
    return %arg0, %c0_i32 : i32, i32
  }
  func.func @transform_2(%arg0: i32) -> (i32, i32) {
    %c0_i32 = arith.constant 0 : i32
    %c0_i32_0 = arith.constant 0 : i32
    %c0_i32_1 = arith.constant 0 : i32
    return %c0_i32, %c0_i32_0 : i32, i32
  }
  func.func @transform_3(%arg0: i32) -> (i32, i32) {
    %c0_i32 = arith.constant 0 : i32
    %c0_i32_0 = arith.constant 0 : i32
    %c0_i32_1 = arith.constant 0 : i32
    return %c0_i32, %c0_i32_0 : i32, i32
  }
  func.func @transform_4(%arg0: i32) -> (i32, i32) {
    %c0_i32 = arith.constant 0 : i32
    %c0_i32_0 = arith.constant 0 : i32
    %c0_i32_1 = arith.constant 0 : i32
    return %c0_i32, %c0_i32_0 : i32, i32
  }
  func.func @transform_5(%arg0: i32) -> (i32, i32) {
    %c0_i32 = arith.constant 0 : i32
    %c0_i32_0 = arith.constant 0 : i32
    %c0_i32_1 = arith.constant 0 : i32
    return %c0_i32, %c0_i32_0 : i32, i32
  }
  func.func @transform_6(%arg0: i32) -> (i32, i32) {
    %c0_i32 = arith.constant 0 : i32
    %c0_i32_0 = arith.constant 0 : i32
    return %arg0, %c0_i32 : i32, i32
  }
}

</mosaic_0001>

<bundles_post_ra>
// kernel: tpu_custom_call.1
= control target key start
LH: loop header
LB: loop body
LE: loop exit
PB: predicated region body
PF: predicated region fallthrough
CT: control target
= control target key end

     0   :  { %11 = vsyncpa [#allocation3], 0  ;;  %s418_s0 = inlined_call_operand.hbm [shape: f32[8,128], index: 0, kind: input, shape index: {}]   ;;  %s419_s1 = inlined_call_operand.vmem [shape: f32[8,2], index: 1, kind: input, shape index: {}]   ;;  %s420_s2 = inlined_call_operand.vmem [shape: f32[1,8], index: 2, kind: input, shape index: {}]   ;;  %s421_s3 = inlined_call_operand.hbm [shape: f32[1,8], index: 3, kind: input, shape index: {}]   ;;  %s422_s4 = inlined_call_operand.vmem [shape: f32[16,128], index: 4, kind: input, shape index: {}]   ;;  %s423_s5 = inlined_call_operand.vmem [shape: f32[1,128], index: 5, kind: input, shape index: {}]   ;;  %s424_s6 = inlined_call_operand.hbm [shape: f32[8,128], index: 6, kind: output, shape index: {}]  }
   0x1   :  { %12 = vsyncpa [#allocation6], 0 }
   0x2   :  { %13 = vsyncpa [#allocation4], 0  ;;  %s352_s21 = smov [#allocation2]   ;;  %s353_s23 = smov [#allocation5]  }
   0x3   :  { %s20_s22 = sshll.u32 %s352_s21, 4  ;;  %s34_s24 = sshll.u32 %s353_s23, 4  ;;  %s21_s22 = int_to_ptr.vmem [resolvable:$true] %s20_s22  ;;  %s35_s24 = int_to_ptr.vmem [resolvable:$true] %s34_s24 }
   0x4   :  { %s294_s25 = scalar_lea.vmem %s21_s22, 128  ;;  %p299_p1 = scmp.lt.s32.totalorder %s21_s22, %s21_s22 }
   0x5   :  { %p295_p0 = scmp.ne.s32.totalorder %s21_s22, %s294_s25  ;;  %p300_p2 = scmp.lt.s32.totalorder %s294_s25, %s294_s25 }
   0x7   :  { %p301_p3 = por %p300_p2, %p299_p1 }
   0x9   :  { %p302_p4 = pnand %p301_p3, %p295_p0 }
   0xb   :  { %305 = shalt.err (!%p302_p4)
}
   0xc   :  { %23 = dma.hbm_to_vmem [thread:$0]  %s418_s0, 128, %s21_s22, [#allocation3]  }
   0xd   :  { %s314_s28 = scalar_lea.vmem %s35_s24, 16  ;;  %s318_s29 = scalar_lea.vmem %s35_s24, 32 }
   0xe   :  { %p315_p5 = scmp.ne.s32.totalorder %s35_s24, %s314_s28  ;;  %p319_p6 = scmp.lt.s32.totalorder %s35_s24, %s35_s24 }
   0xf   :  { %p320_p7 = scmp.lt.s32.totalorder %s318_s29, %s314_s28 }
  0x11   :  { %p321_p8 = por %p320_p7, %p319_p6 }
  0x13   :  { %p322_p9 = pnand %p321_p8, %p315_p5 }
  0x15   :  { %325 = shalt.err (!%p322_p9)
}
  0x16   :  { %37 = dma.hbm_to_vmem [thread:$0]  %s421_s3, 16, %s35_s24, [#allocation6]  }
  0x17   :  { %346 = dma.done.wait [#allocation3], 128  }
  0x18   :  { %347 = vsyncadd [#allocation3], 4294967168 }
  0x19   :  { %348 = dma.done.wait [#allocation6], 16  }
  0x1a   :  { %349 = vsyncadd [#allocation6], 4294967280  ;;  %v354_v0 = vmov 0   ;;  %v48_v1 = vld [vmem:[%s419_s1] sm:$0xff]  ;;  %v355_v2 = vmov 1   ;;  %v356_v4 = vmov 0.0  }
  0x1b   :  { %280 = vset.pattern.permute.xlu0 %v354_v0  ;;  %v49_v3 = vld [vmem:[%s422_s4] sm:$0xff]  ;;  %268 = vmatprep.subr.mxu1 %v356_v4  ;;  %vm357_vm0 = vmmov 0   ;;  %v50_v5 = vld [vmem:[%s422_s4 + $0x8] sm:$0xff]  ;;  %vm80_vm1 = vcmask 64512  }
  0x1c   :  { %54 = vperm.xlu0 %280, %v48_v1   ;;  %270 = vmatprep.mubr.msk.f32.mxu1 %vm357_vm0, %v356_v4  ;;  %v254_v6 = vld [vmem:[%s420_s2] ss:$0 sm:$0xff]  ;;  %v255_v7 = vld [vmem:[#allocation5] ss:$0 sm:$0xff]  ;;  %s358_s2 = smov [#allocation7]  }
  0x1d   :  { %269 = vmatpush3.msra.mxu1 %v49_v3  ;;  %263 = vmatprep.subr.mxu0 %v356_v4  ;;  %v258_v19 = vld [vmem:[%s423_s5] ss:$0 sm:$0xff]  ;;  %s244_s14 = sshll.u32 %s358_s2, 4  ;;  %s245_s14 = int_to_ptr.vmem [resolvable:$true] %s244_s14 }
  0x1e   :  { %265 = vmatprep.mubr.msk.f32.mxu0 %vm357_vm0, %v356_v4  ;;  %264 = vmatpush3.msra.mxu0 %v50_v5  ;;  %v235_v22 = vld [vmem:[#allocation2] sm:$0xff]  ;;  %s326_s15 = scalar_lea.vmem %s245_s14, 128  ;;  %p331_p11 = scmp.lt.s32.totalorder %s245_s14, %s245_s14 }
  0x1f   :  { %p327_p10 = scmp.ne.s32.totalorder %s245_s14, %s326_s15  ;;  %p332_p12 = scmp.lt.s32.totalorder %s326_s15, %s326_s15 }
  0x20   :  { %281 = vset.pattern.permute.xlu0 %v355_v2 }
  0x21   :  { %74 = vperm.xlu0 %281, %v48_v1   ;;  %p333_p13 = por %p332_p12, %p331_p11 }
  0x23   :  { %p334_p0 = pnand %p333_p13, %p327_p10 }
  0x97   :  { %v55_v8 = vpop.permute.xlu0 %54 }
  0x98   :  { %v63_v9 = vmul.f32 %v254_v6, %v55_v8 }
  0x9a   :  { %v71_v10 = vadd.f32 %v255_v7, %v63_v9 }
  0x9c   :  { %282 = vtanh.f32 %v71_v10  ;;  %v75_v11 = vpop.permute.xlu0 %74 }
  0x9d   :  { %v77_v12 = vmul.f32 %v254_v6, %v75_v11 }
  0x9f   :  { %v78_v13 = vadd.f32 %v255_v7, %v77_v12 }
  0xa1   :  { %284 = vtanh.f32 %v78_v13 }
  0xa9   :  { %v283_v14 = vpop.eup %282 }
  0xaa   :  { %271 = vmatmul.mubr.msk.f32.vlgmr.msra.gmra.mxu1 %vm80_vm1, %v283_v14 }
  0xae   :  { %v285_v15 = vpop.eup %284 }
  0xaf   :  { %266 = vmatmul.mubr.msk.f32.vlgmr.msra.gmra.mxu0 %vm80_vm1, %v285_v15 }
 0x16a   :  { %v223_v16 = vpop.f32.mrf.mxu1 }
 0x16c   :  { %v272_v17 = vpop.f32.mrf.mxu1 }
 0x16f   :  { %v150_v18 = vpop.f32.mrf.mxu0 }
 0x170   :  { %v224_v20 = vadd.f32 %v223_v16, %v150_v18 }
 0x171   :  { %v267_v21 = vpop.f32.mrf.mxu0 }
 0x172   :  { %v234_v23 = vadd.f32 %v258_v19, %v224_v20 }
 0x174   :  { %v236_v24 = vadd.f32 %v235_v22, %v234_v23 }
 0x176   :  { %237 = vst [vmem:[#allocation7] sm:$0xff] %v236_v24 }
 0x177   :  { %337 = shalt.err (!%p334_p0)
}
 0x178   :  { %247 = dma.vmem_to_hbm [thread:$0]  %s245_s14, 128, %s424_s6, [#allocation4]  }
 0x179   :  { %350 = dma.done.wait [#allocation4], 128  }
 0x17a   :  { %351 = vsyncadd [#allocation4], 4294967168 }
 0x17b   :  { %251 = vsyncpa [#allocation3], 1 }
 0x17c   :  { %252 = vsyncpa [#allocation6], 1 }
 0x17d   :  { %253 = vsyncpa [#allocation4], 1 }

</bundles_post_ra>
